<compile_context>
chip_gen: v7x
topology: tpu7x:2x2x1
jax: 0.10.0
libtpu: 0.0.40
codegen_flags: <defaults>
</compile_context>

<pallas_src>
import functools

import jax
import jax.numpy as jnp
from jax.experimental import pallas as pl
from jax.experimental.pallas import tpu as pltpu

HID = 64        # hidden width of the policy net
OUT = 2         # output features
HID_AUG = 72    # 64 hidden + 1 constant-1 bias lane, zero-padded to a multiple of 8


def walk_policy_kernel(x_ref, w1_ref, b1_ref, w2_ref, w3_ref, o_ref):
    x = x_ref[...]                                            # (1, TB) f32
    # Layer 1: Linear(1, 64) + ReLU.  K=1 -> pure VPU broadcast mul-add.
    # Row HID is the constant-1 bias lane (w1=0, b1=1 -> relu(1) = 1);
    # rows HID+1.. are zero padding.
    h1 = jnp.maximum(w1_ref[...] * x + b1_ref[...], 0.0)      # (HID_AUG, TB) f32
    h1 = h1.astype(w2_ref.dtype)                              # bf16 for the MXU
    # Layer 2: [W2 | b2] @ h1 on the MXU (f32 accumulate) + ReLU.
    # The pass-through row keeps the bias lane at 1 for layer 3.
    h2 = jnp.dot(w2_ref[...], h1, preferred_element_type=jnp.float32)
    h2 = jnp.maximum(h2, 0.0).astype(w3_ref.dtype)            # (HID_AUG, TB)
    # Layer 3: [W3 | b3] @ h2 -> (OUT, TB); lane-dense store, no bias add.
    o_ref[...] = jnp.dot(w3_ref[...], h2,
                         preferred_element_type=jnp.float32).astype(o_ref.dtype)


def _round_up(n, m):
    return ((n + m - 1) // m) * m


def _choose_tb(batch, max_tb):
    """Batch-tile width: big tiles amortize the ~0.35us/step overhead, tiny
    batches get a single small tile (no dead work), large batches get >=2
    tiles so both v7x TensorCores see work, capped for VMEM."""
    bp = _round_up(max(batch, 1), 128)
    if bp <= 256:
        return bp                                    # tiny batch: one small tile
    return min(max_tb, _round_up(pl.cdiv(bp, 2), 128))


@functools.partial(jax.jit, static_argnames=("max_tb", "feature_major"))
def walk_policy_forward(x, kernel_params, *, max_tb=8192, feature_major=False):
    """x: (B, 1) float32 -> (B, 2) float32 (same semantics as the nn.Module).

    With feature_major=True the (2, B) slab is returned directly, skipping the
    wrapper transpose for downstream code that can consume it.
    """
    w1a, b1a, w2a, w3a = kernel_params
    B = x.shape[0]

    tb = _choose_tb(B, max_tb)
    grid_b = pl.cdiv(B, tb)
    Bp = grid_b * tb

    # Batch on the lane axis; zero-pad batch up to a multiple of the tile.
    xt = x.reshape(1, B)
    if Bp != B:
        xt = jnp.pad(xt, ((0, 0), (0, Bp - B)))

    out = pl.pallas_call(
        walk_policy_kernel,
        out_shape=jax.ShapeDtypeStruct((OUT, Bp), jnp.float32),
        grid_spec=pltpu.PrefetchScalarGridSpec(
            num_scalar_prefetch=0,
            grid=(grid_b,),
            in_specs=[
                pl.BlockSpec((1, tb), lambda i: (0, i)),            # x tile
                pl.BlockSpec((HID_AUG, 1), lambda i: (0, 0)),       # w1 (72,1) f32
                pl.BlockSpec((HID_AUG, 1), lambda i: (0, 0)),       # b1 (72,1) f32
                pl.BlockSpec((HID_AUG, HID_AUG), lambda i: (0, 0)), # [W2|b2] (72,72)
                pl.BlockSpec((OUT, HID_AUG), lambda i: (0, 0)),     # [W3|b3] (2,72)
            ],
            out_specs=pl.BlockSpec((OUT, tb), lambda i: (0, i)),
        ),
        compiler_params=pltpu.CompilerParams(
            dimension_semantics=("parallel",),
            vmem_limit_bytes=48 * 1024 * 1024,
        ),
    )(xt, w1a, b1a, w2a, w3a)

    out = out[:, :B]                      # drop zero-padded batch columns
    return out if feature_major else out.T


def init_torch_params(key):
    """PyTorch-shaped params: list of (W(out,in), b(out,)) with nn.Linear init."""
    ks = jax.random.split(key, 6)

    def linear_init(kw, kb, fan_in, fan_out):
        bound = 1.0 / jnp.sqrt(float(fan_in))
        W = jax.random.uniform(kw, (fan_out, fan_in), jnp.float32, -bound, bound)
        b = jax.random.uniform(kb, (fan_out,), jnp.float32, -bound, bound)
        return W, b

    return [linear_init(ks[0], ks[1], 1, HID),
            linear_init(ks[2], ks[3], HID, HID),
            linear_init(ks[4], ks[5], HID, OUT)]


def prepare_kernel_params(torch_params, mxu_dtype=jnp.bfloat16):
    """Convert PyTorch (out,in)/(out,) params to the kernel's augmented,
    feature-major layout.  Padding rows/cols are zero so they contribute
    nothing; row HID is the constant-1 bias lane."""
    (W1, b1), (W2, b2), (W3, b3) = torch_params
    # Layer 1 stays f32 (VPU); row HID: w=0, b=1 -> h1[HID] = relu(1) = 1.
    w1a = jnp.zeros((HID_AUG, 1), jnp.float32).at[:HID, 0].set(W1[:, 0])
    b1a = (jnp.zeros((HID_AUG, 1), jnp.float32)
           .at[:HID, 0].set(b1).at[HID, 0].set(1.0))
    # Layer 2: [W2 | b2] plus a pass-through row keeping the bias lane at 1.
    w2a = (jnp.zeros((HID_AUG, HID_AUG), jnp.float32)
           .at[:HID, :HID].set(W2)
           .at[:HID, HID].set(b2)
           .at[HID, HID].set(1.0))
    # Layer 3: [W3 | b3].
    w3a = (jnp.zeros((OUT, HID_AUG), jnp.float32)
           .at[:, :HID].set(W3)
           .at[:, HID].set(b3))
    return (w1a, b1a, w2a.astype(mxu_dtype), w3a.astype(mxu_dtype))


def reference_forward(x, torch_params):
    (W1, b1), (W2, b2), (W3, b3) = torch_params
    h1 = jnp.maximum(x @ W1.T + b1, 0.0)
    h2 = jnp.maximum(h1 @ W2.T + b2, 0.0)
    return h2 @ W3.T + b3


if __name__ == "__main__":
    key = jax.random.PRNGKey(0)
    kx1, kx2, kp = jax.random.split(key, 3)

    torch_params = init_torch_params(kp)
    params_bf16 = prepare_kernel_params(torch_params, mxu_dtype=jnp.bfloat16)
    params_f32 = prepare_kernel_params(torch_params, mxu_dtype=jnp.float32)

    # Small batch (matches the toy module usage): bf16 MXU path.
    B1 = 8
    x1 = jax.random.normal(kx1, (B1, 1), jnp.float32)
    out1 = jax.block_until_ready(walk_policy_forward(x1, params_bf16))
    ref1 = reference_forward(x1, torch_params)
    assert out1.shape == (B1, OUT)
    assert jnp.allclose(out1, ref1, atol=5e-2, rtol=5e-2), "bf16 path mismatch"

    # Larger batch exercising a multi-step grid + non-divisible padding,
    # f32 fallback path checked at tight tolerance.
    B2 = 300
    x2 = jax.random.normal(kx2, (B2, 1), jnp.float32)
    out2 = jax.block_until_ready(walk_policy_forward(x2, params_f32))
    ref2 = reference_forward(x2, torch_params)
    assert out2.shape == (B2, OUT)
    assert jnp.allclose(out2, ref2, atol=1e-4, rtol=1e-5), "f32 path mismatch"

    print("KERNEL_OK")
</pallas_src>

<mosaic_0001>
module attributes {stable_mosaic.version = 11 : i64} {
  func.func @walk_policy_kernel(%arg0: i32, %arg1: memref<1x128xf32, #tpu.memory_space<vmem>>, %arg2: memref<72x1xf32, #tpu.memory_space<vmem>>, %arg3: memref<72x1xf32, #tpu.memory_space<vmem>>, %arg4: memref<72x72xbf16, #tpu.memory_space<vmem>>, %arg5: memref<2x72xbf16, #tpu.memory_space<vmem>>, %arg6: memref<2x128xf32, #tpu.memory_space<vmem>>) attributes {dimension_semantics = [#tpu.dimension_semantics<parallel>], iteration_bounds = array<i64: 1>, scalar_prefetch = 0 : i64, scratch_operands = 0 : i64, tpu.core_type = #tpu.core_type<tc>, window_params = [{transform_indices = @transform_0, window_bounds = array<i64: 1, 128>}, {pipeline_mode = #tpu.pipeline_mode<synchronous>, transform_indices = @transform_1, window_bounds = array<i64: 72, 1>}, {pipeline_mode = #tpu.pipeline_mode<synchronous>, transform_indices = @transform_2, window_bounds = array<i64: 72, 1>}, {pipeline_mode = #tpu.pipeline_mode<synchronous>, transform_indices = @transform_3, window_bounds = array<i64: 72, 72>}, {pipeline_mode = #tpu.pipeline_mode<synchronous>, transform_indices = @transform_4, window_bounds = array<i64: 2, 72>}, {transform_indices = @transform_5, window_bounds = array<i64: 2, 128>}]} {
    %c0 = arith.constant 0 : index
    %c0_0 = arith.constant 0 : index
    %0 = vector.load %arg1[%c0, %c0_0] : memref<1x128xf32, #tpu.memory_space<vmem>>, vector<1x128xf32>
    %c0_1 = arith.constant 0 : index
    %c0_2 = arith.constant 0 : index
    %1 = vector.load %arg2[%c0_1, %c0_2] : memref<72x1xf32, #tpu.memory_space<vmem>>, vector<72x1xf32>
    %2 = vector.broadcast %1 : vector<72x1xf32> to vector<72x128xf32>
    %3 = vector.broadcast %0 : vector<1x128xf32> to vector<72x128xf32>
    %4 = arith.mulf %2, %3 : vector<72x128xf32>
    %c0_3 = arith.constant 0 : index
    %c0_4 = arith.constant 0 : index
    %5 = vector.load %arg3[%c0_3, %c0_4] : memref<72x1xf32, #tpu.memory_space<vmem>>, vector<72x1xf32>
    %6 = vector.broadcast %5 : vector<72x1xf32> to vector<72x128xf32>
    %7 = arith.addf %4, %6 : vector<72x128xf32>
    %cst = arith.constant 0.000000e+00 : f32
    %8 = vector.broadcast %cst : f32 to vector<72x128xf32>
    %9 = arith.maximumf %7, %8 : vector<72x128xf32>
    %10 = arith.truncf %9 : vector<72x128xf32> to vector<72x128xbf16>
    %c0_5 = arith.constant 0 : index
    %c0_6 = arith.constant 0 : index
    %11 = vector.load %arg4[%c0_5, %c0_6] : memref<72x72xbf16, #tpu.memory_space<vmem>>, vector<72x72xbf16>
    %cst_7 = arith.constant dense<0.000000e+00> : vector<72x128xf32>
    %12 = tpu.matmul %11, %10, %cst_7 {dimension_numbers = #tpu.dot_dimension_numbers<[1], [0], [0], [1], [0, 0, 1, 1], [], []>} : vector<72x72xbf16>, vector<72x128xbf16>, vector<72x128xf32> -> vector<72x128xf32>
    %cst_8 = arith.constant 0.000000e+00 : f32
    %13 = vector.broadcast %cst_8 : f32 to vector<72x128xf32>
    %14 = arith.maximumf %12, %13 : vector<72x128xf32>
    %15 = arith.truncf %14 : vector<72x128xf32> to vector<72x128xbf16>
    %c0_9 = arith.constant 0 : index
    %c0_10 = arith.constant 0 : index
    %16 = vector.load %arg5[%c0_9, %c0_10] : memref<2x72xbf16, #tpu.memory_space<vmem>>, vector<2x72xbf16>
    %cst_11 = arith.constant dense<0.000000e+00> : vector<2x128xf32>
    %17 = tpu.matmul %16, %15, %cst_11 {dimension_numbers = #tpu.dot_dimension_numbers<[1], [0], [0], [1], [0, 0, 1, 1], [], []>} : vector<2x72xbf16>, vector<72x128xbf16>, vector<2x128xf32> -> vector<2x128xf32>
    %c0_12 = arith.constant 0 : index
    %c0_13 = arith.constant 0 : index
    %18 = vector.load %arg6[%c0_12, %c0_13] : memref<2x128xf32, #tpu.memory_space<vmem>>, vector<2x128xf32>
    tpu.vector_store %arg6[%c0_12, %c0_13], %17 {strides = array<i32>} : memref<2x128xf32, #tpu.memory_space<vmem>>, vector<2x128xf32>,
    return
  }
  func.func @transform_0(%arg0: i32) -> (i32, i32) {
    %c0_i32 = arith.constant 0 : i32
    %c0_i32_0 = arith.constant 0 : i32
    return %c0_i32, %arg0 : i32, i32
  }
  func.func @transform_1(%arg0: i32) -> (i32, i32) {
    %c0_i32 = arith.constant 0 : i32
    %c0_i32_0 = arith.constant 0 : i32
    %c0_i32_1 = arith.constant 0 : i32
    return %c0_i32, %c0_i32_0 : i32, i32
  }
  func.func @transform_2(%arg0: i32) -> (i32, i32) {
    %c0_i32 = arith.constant 0 : i32
    %c0_i32_0 = arith.constant 0 : i32
    %c0_i32_1 = arith.constant 0 : i32
    return %c0_i32, %c0_i32_0 : i32, i32
  }
  func.func @transform_3(%arg0: i32) -> (i32, i32) {
    %c0_i32 = arith.constant 0 : i32
    %c0_i32_0 = arith.constant 0 : i32
    %c0_i32_1 = arith.constant 0 : i32
    return %c0_i32, %c0_i32_0 : i32, i32
  }
  func.func @transform_4(%arg0: i32) -> (i32, i32) {
    %c0_i32 = arith.constant 0 : i32
    %c0_i32_0 = arith.constant 0 : i32
    %c0_i32_1 = arith.constant 0 : i32
    return %c0_i32, %c0_i32_0 : i32, i32
  }
  func.func @transform_5(%arg0: i32) -> (i32, i32) {
    %c0_i32 = arith.constant 0 : i32
    %c0_i32_0 = arith.constant 0 : i32
    return %c0_i32, %arg0 : i32, i32
  }
}

</mosaic_0001>

<bundles_post_ra>
// kernel: walk_policy_forward.1
= control target key start
LH: loop header
LB: loop body
LE: loop exit
PB: predicated region body
PF: predicated region fallthrough
CT: control target
= control target key end

     0   :  { %v440_v0 = vmov 0   ;;  %v441_v9 = vmov 0.0   ;;  %vm442_vm0 = vmmov 0   ;;  %vm216_vm1 = vcmask 1043456   ;;  %s581_s2 = inlined_call_operand.vmem [shape: f32[72,1], index: 2, kind: input, shape index: {}]   ;;  %s582_s1 = inlined_call_operand.vmem [shape: f32[72,1], index: 1, kind: input, shape index: {}]   ;;  %s583_s3 = inlined_call_operand.vmem [shape: bf16[72,72], index: 3, kind: input, shape index: {}]   ;;  %s584_s0 = inlined_call_operand.vmem [shape: f32[1,128], index: 0, kind: input, shape index: {}]   ;;  %s585_s4 = inlined_call_operand.vmem [shape: bf16[2,72], index: 4, kind: input, shape index: {}]   ;;  %s586_s5 = inlined_call_operand.vmem [shape: f32[2,128], index: 5, kind: output, shape index: {}]  }
   0x1   :  { %434 = vset.pattern.permute.xlu1 %v440_v0  ;;  %433 = vset.pattern.permute.xlu0 %v440_v0  ;;  %v91_v1 = vld [vmem:[%s581_s2] sm:$0xff]  ;;  %v92_v3 = vld [vmem:[%s581_s2 + $0x8] sm:$0xff]  ;;  %v25_v5 = vld [vmem:[%s582_s1 + $0x18] sm:$0xff]  ;;  %vm200_vm2 = vcmask 588800  }
   0x2   :  { %v22_v2 = vld [vmem:[%s582_s1] sm:$0xff]  ;;  %102 = vperm.xlu1 %434, %v91_v1   ;;  %v23_v4 = vld [vmem:[%s582_s1 + $0x8] sm:$0xff]  ;;  %v24_v6 = vld [vmem:[%s582_s1 + $0x10] sm:$0xff]  ;;  %386 = vmatprep.subr.bf16.mxu0 %v441_v9 }
   0x3   :  { %33 = vperm.xlu0 %433, %v22_v2   ;;  %v94_v7 = vld [vmem:[%s581_s2 + $0x18] sm:$0xff]  ;;  %v93_v8 = vld [vmem:[%s581_s2 + $0x10] sm:$0xff]  ;;  %416 = vmatprep.subr.bf16.mxu1 %v441_v9  ;;  %v27_v10 = vld [vmem:[%s582_s1 + $0x28] sm:$0xff] }
   0x4   :  { %v26_v11 = vld [vmem:[%s582_s1 + $0x20] sm:$0xff]  ;;  %v96_v12 = vld [vmem:[%s581_s2 + $0x28] sm:$0xff]  ;;  %v29_v14 = vld [vmem:[%s582_s1 + $0x38] sm:$0xff]  ;;  %396 = vmatprep.mubr.msk.bf16.mxu0 %vm442_vm0, %v441_v9  ;;  %426 = vmatprep.mubr.msk.bf16.mxu1 %vm442_vm0, %v441_v9 }
   0x5   :  { %v95_v13 = vld [vmem:[%s581_s2 + $0x20] sm:$0xff]  ;;  %v28_v15 = vld [vmem:[%s582_s1 + $0x30] sm:$0xff]  ;;  %v98_v16 = vld [vmem:[%s581_s2 + $0x38] sm:$0xff] }
   0x6   :  { %107 = vperm.xlu1 %434, %v92_v3   ;;  %v97_v17 = vld [vmem:[%s581_s2 + $0x30] sm:$0xff]  ;;  %v99_v18 = vld [vmem:[%s581_s2 + $0x40] sm:$0xff] }
   0x7   :  { %38 = vperm.xlu0 %433, %v23_v4   ;;  %v30_v19 = vld [vmem:[%s582_s1 + $0x40] sm:$0xff] }
   0x8   :  { %v358_v20 = vld [vmem:[%s584_s0] ss:$0 sm:$0xff] }
   0xa   :  { %48 = vperm.xlu1 %434, %v25_v5  }
   0xb   :  { %43 = vperm.xlu0 %433, %v24_v6  }
   0xe   :  { %117 = vperm.xlu1 %434, %v94_v7  }
   0xf   :  { %112 = vperm.xlu0 %433, %v93_v8   ;;  %v435_v8 = vld [vmem:[%s583_s3] sm:$0xff]  }
  0x12   :  { %58 = vperm.xlu1 %434, %v27_v10   ;;  %v436_v10 = vld [vmem:[%s583_s3 + $0x8] sm:$0xff]  }
  0x13   :  { %53 = vperm.xlu0 %433, %v26_v11   ;;  %v437_v11 = vld [vmem:[%s583_s3 + $0x10] sm:$0xff]  }
  0x16   :  { %127 = vperm.xlu1 %434, %v96_v12   ;;  %v438_v12 = vld [vmem:[%s583_s3 + $0x18] sm:$0xff]  }
  0x17   :  { %122 = vperm.xlu0 %433, %v95_v13   ;;  %v439_v13 = vld [vmem:[%s583_s3 + $0x20] ss:$0 sps:$4 sm:$0xff]  }
  0x1a   :  { %68 = vperm.xlu1 %434, %v29_v14  }
  0x1b   :  { %63 = vperm.xlu0 %433, %v28_v15  }
  0x1e   :  { %137 = vperm.xlu1 %434, %v98_v16  }
  0x1f   :  { %132 = vperm.xlu0 %433, %v97_v17  }
  0x22   :  { %142 = vperm.xlu1 %434, %v99_v18  }
  0x23   :  { %73 = vperm.xlu0 %433, %v30_v19  }
  0x81   :  { %v103_v21 = vpop.permute.xlu1 %102 }
  0x82   :  { %v34_v22 = vpop.permute.xlu0 %33 }
  0x83   :  { %v82_v23 = vmul.f32 %v358_v20, %v34_v22 }
  0x85   :  { %v108_v24 = vpop.permute.xlu1 %107  ;;  %v145_v26 = vadd.f32 %v103_v21, %v82_v23 }
  0x86   :  { %v39_v25 = vpop.permute.xlu0 %38 }
  0x87   :  { %v83_v27 = vmul.f32 %v358_v20, %v39_v25  ;;  %v154_v31 = vmax.f32 %v145_v26, 0.0 }
  0x89   :  { %v146_v28 = vadd.f32 %v108_v24, %v83_v27  ;;  %v49_v29 = vpop.permute.xlu1 %48 }
  0x8a   :  { %v44_v30 = vpop.permute.xlu0 %43  ;;  %v85_v33 = vmul.f32 %v358_v20, %v49_v29 }
  0x8b   :  { %v155_v32 = vmax.f32 %v146_v28, 0.0  ;;  %v84_v34 = vmul.f32 %v358_v20, %v44_v30 }
  0x8d   :  { %v163_v35 = vpack.c.bf16 %v155_v32, %v154_v31  ;;  %v118_v36 = vpop.permute.xlu1 %117 }
  0x8e   :  { %v113_v37 = vpop.permute.xlu0 %112  ;;  %v148_v38 = vadd.f32 %v118_v36, %v85_v33 }
  0x8f   :  { %v147_v39 = vadd.f32 %v113_v37, %v84_v34  ;;  %387 = vmatpush3.bf16.msra.mxu0 %v163_v35 }
  0x90   :  { %388 = vmatprep.subr.bf16.mxu0 %v441_v9  ;;  %v157_v40 = vmax.f32 %v148_v38, 0.0 }
  0x91   :  { %v156_v41 = vmax.f32 %v147_v39, 0.0  ;;  %v59_v42 = vpop.permute.xlu1 %58 }
  0x92   :  { %v54_v43 = vpop.permute.xlu0 %53  ;;  %v87_v45 = vmul.f32 %v358_v20, %v59_v42 }
  0x93   :  { %v164_v44 = vpack.c.bf16 %v157_v40, %v156_v41  ;;  %v86_v46 = vmul.f32 %v358_v20, %v54_v43 }
  0x95   :  { %389 = vmatpush3.bf16.msra.mxu0 %v164_v44  ;;  %v128_v47 = vpop.permute.xlu1 %127 }
  0x96   :  { %v123_v48 = vpop.permute.xlu0 %122  ;;  %390 = vmatprep.subr.bf16.mxu0 %v441_v9  ;;  %v150_v49 = vadd.f32 %v128_v47, %v87_v45 }
  0x97   :  { %v149_v50 = vadd.f32 %v123_v48, %v86_v46 }
  0x98   :  { %v159_v51 = vmax.f32 %v150_v49, 0.0  ;;  %v306_v49 = vld [vmem:[%s585_s4] sm:$0x1] }
  0x99   :  { %v158_v52 = vmax.f32 %v149_v50, 0.0  ;;  %v69_v53 = vpop.permute.xlu1 %68 }
  0x9a   :  { %v64_v54 = vpop.permute.xlu0 %63  ;;  %v89_v56 = vmul.f32 %v358_v20, %v69_v53 }
  0x9b   :  { %v165_v55 = vpack.c.bf16 %v159_v51, %v158_v52  ;;  %v88_v57 = vmul.f32 %v358_v20, %v64_v54 }
  0x9d   :  { %391 = vmatpush3.bf16.msra.mxu0 %v165_v55  ;;  %v138_v58 = vpop.permute.xlu1 %137 }
  0x9e   :  { %v133_v59 = vpop.permute.xlu0 %132  ;;  %392 = vmatprep.subr.bf16.mxu0 %v441_v9  ;;  %v152_v60 = vadd.f32 %v138_v58, %v89_v56 }
  0x9f   :  { %v151_v61 = vadd.f32 %v133_v59, %v88_v57 }
  0xa0   :  { %v161_v62 = vmax.f32 %v152_v60, 0.0 }
  0xa1   :  { %v160_v63 = vmax.f32 %v151_v61, 0.0  ;;  %v143_v3 = vpop.permute.xlu1 %142 }
  0xa2   :  { %v74_v0 = vpop.permute.xlu0 %73 }
  0xa3   :  { %v166_v1 = vpack.c.bf16 %v161_v62, %v160_v63  ;;  %v90_v2 = vmul.f32 %v358_v20, %v74_v0 }
  0xa5   :  { %v153_v4 = vadd.f32 %v143_v3, %v90_v2  ;;  %393 = vmatpush3.bf16.msra.mxu0 %v166_v1 }
  0xa6   :  { %394 = vmatprep.subr.bf16.mxu0 %v441_v9 }
  0xa7   :  { %v162_v5 = vmax.f32 %v153_v4, 0.0 }
  0xa9   :  { %v167_v6 = vpack.c.bf16 %v162_v5, %v162_v5 }
  0xab   :  { %v218_v7 = vsel %vm216_vm1, %v167_v6, 0 }
  0xac   :  { %395 = vmatpush3.bf16.msra.mxu0 %v218_v7 }
  0xaf   :  { %397 = vmatmul.mubr.msk.bf16.vlgmr.msra.gmra.mrb[0].mxu0 %vm200_vm2, %v435_v8 }
  0xb0   :  { %400 = vmatprep.mubr.msk.bf16.mxu0 %vm442_vm0, %v441_v9 }
  0xb7   :  { %401 = vmatmul.mubr.msk.bf16.gmra.mrb[4].mxu0 %vm200_vm2, %v436_v10 }
  0xb8   :  { %404 = vmatprep.mubr.msk.bf16.mxu0 %vm442_vm0, %v441_v9 }
  0xbf   :  { %405 = vmatmul.mubr.msk.bf16.gmra.mrb[8].mxu0 %vm200_vm2, %v437_v11 }
  0xc0   :  { %408 = vmatprep.mubr.msk.bf16.mxu0 %vm442_vm0, %v441_v9 }
  0xc7   :  { %409 = vmatmul.mubr.msk.bf16.gmra.mrb[12].mxu0 %vm200_vm2, %v438_v12 }
  0xc8   :  { %412 = vmatprep.mubr.msk.bf16.mxu0 %vm442_vm0, %v441_v9 }
  0xcf   :  { %413 = vmatmul.mubr.msk.bf16.gmra.mrb[16].mxu0 %vm200_vm2, %v439_v13 }
 0x182   :  { %v254_v14 = vpop.f32.mrb[0].mxu0 }
 0x183   :  { %v398_v15 = vpop.f32.mrb[1].mxu0  ;;  %v292_v17 = vmax.f32 %v254_v14, 0.0 }
 0x184   :  { %v257_v16 = vpop.f32.mrb[2].mxu0 }
 0x185   :  { %v293_v18 = vmax.f32 %v257_v16, 0.0  ;;  %v399_v19 = vpop.f32.mrb[3].mxu0 }
 0x187   :  { %v301_v20 = vpack.c.bf16 %v293_v18, %v292_v17 }
 0x189   :  { %417 = vmatpush3.bf16.msra.mxu1 %v301_v20 }
 0x18a   :  { %v262_v21 = vpop.f32.mrb[4].mxu0  ;;  %418 = vmatprep.subr.bf16.mxu1 %v441_v9 }
 0x18b   :  { %v402_v22 = vpop.f32.mrb[5].mxu0  ;;  %v294_v24 = vmax.f32 %v262_v21, 0.0 }
 0x18c   :  { %v265_v23 = vpop.f32.mrb[6].mxu0 }
 0x18d   :  { %v295_v25 = vmax.f32 %v265_v23, 0.0  ;;  %v403_v26 = vpop.f32.mrb[7].mxu0 }
 0x18f   :  { %v302_v27 = vpack.c.bf16 %v295_v25, %v294_v24 }
 0x191   :  { %419 = vmatpush3.bf16.msra.mxu1 %v302_v27 }
 0x192   :  { %v270_v28 = vpop.f32.mrb[8].mxu0  ;;  %420 = vmatprep.subr.bf16.mxu1 %v441_v9 }
 0x193   :  { %v406_v29 = vpop.f32.mrb[9].mxu0  ;;  %v296_v31 = vmax.f32 %v270_v28, 0.0 }
 0x194   :  { %v273_v30 = vpop.f32.mrb[10].mxu0 }
 0x195   :  { %v297_v32 = vmax.f32 %v273_v30, 0.0  ;;  %v407_v33 = vpop.f32.mrb[11].mxu0 }
 0x197   :  { %v303_v34 = vpack.c.bf16 %v297_v32, %v296_v31 }
 0x199   :  { %421 = vmatpush3.bf16.msra.mxu1 %v303_v34 }
 0x19a   :  { %v278_v35 = vpop.f32.mrb[12].mxu0  ;;  %422 = vmatprep.subr.bf16.mxu1 %v441_v9 }
 0x19b   :  { %v410_v36 = vpop.f32.mrb[13].mxu0  ;;  %v298_v38 = vmax.f32 %v278_v35, 0.0 }
 0x19c   :  { %v281_v37 = vpop.f32.mrb[14].mxu0 }
 0x19d   :  { %v299_v39 = vmax.f32 %v281_v37, 0.0  ;;  %v411_v40 = vpop.f32.mrb[15].mxu0 }
 0x19f   :  { %v304_v41 = vpack.c.bf16 %v299_v39, %v298_v38 }
 0x1a1   :  { %423 = vmatpush3.bf16.msra.mxu1 %v304_v41 }
 0x1a2   :  { %v286_v42 = vpop.f32.mrb[16].mxu0  ;;  %424 = vmatprep.subr.bf16.mxu1 %v441_v9 }
 0x1a3   :  { %v300_v43 = vmax.f32 %v286_v42, 0.0  ;;  %v414_v44 = vpop.f32.mrb[17].mxu0 }
 0x1a4   :  { %v289_v45 = vpop.f32.mrb[18].mxu0 }
 0x1a5   :  { %v305_v46 = vpack.c.bf16 %v300_v43, %v300_v43  ;;  %v415_v47 = vpop.f32.mrb[19].mxu0 }
 0x1a7   :  { %v311_v48 = vsel %vm216_vm1, %v305_v46, 0 }
 0x1a8   :  { %425 = vmatpush3.bf16.msra.mxu1 %v311_v48 }
 0x1ab   :  { %427 = vmatmul.mubr.msk.bf16.vlgmr.msra.gmra.mrb[0].mxu1 %vm200_vm2, %v306_v49 }
 0x27e   :  { %v347_v50 = vpop.f32.mrb[0].mxu1 }
 0x27f   :  { %353 = vst [vmem:[%s586_s5] sm:$0x3] %v347_v50  ;;  %v428_v9 = vpop.f32.mrb[1].mxu1 }
 0x280   :  { %v350_v51 = vpop.f32.mrb[2].mxu1 }
 0x281   :  { %v429_v52 = vpop.f32.mrb[3].mxu1 }

</bundles_post_ra>
